<compile_context>
chip_gen: v6e
topology: v6e:2x2x1
jax: 0.10.0
libtpu: 0.0.40
codegen_flags: <defaults>
</compile_context>

<pallas_src>
import jax
import jax.numpy as jnp
from jax.experimental import pallas as pl
from jax.experimental.pallas import tpu as pltpu

LOG_STD_MIN = -5.0
LOG_STD_MAX = 2.0


def _round_up(n, m):
    return ((n + m - 1) // m) * m


# ----------------------------------------------------------------------------
# Kernel
# ----------------------------------------------------------------------------
def gaussian_policy_kernel(x_ref, w1_ref, b1_ref, w2_ref, b2_ref,
                           wm_ref, bm_ref, mean_ref):
    x = x_ref[...]
    # MLP trunk: Linear -> ReLU -> Linear -> ReLU  (output_activation=ReLU)
    h1 = jnp.maximum(
        jnp.dot(x, w1_ref[...], preferred_element_type=jnp.float32) + b1_ref[...],
        0.0)
    h2 = jnp.maximum(
        jnp.dot(h1.astype(w2_ref.dtype), w2_ref[...],
                preferred_element_type=jnp.float32) + b2_ref[...],
        0.0)
    # mean head + mean transform: action_means + action_magnitudes * tanh(.)
    # defaults (action_means=0, action_magnitudes=1) -> tanh(.)
    pre_mean = jnp.dot(h2.astype(wm_ref.dtype), wm_ref[...],
                       preferred_element_type=jnp.float32) + bm_ref[...]
    a = mean_ref.shape[-1]            # store only the real action columns
    mean_ref[...] = jnp.tanh(pre_mean[:, :a])


# ----------------------------------------------------------------------------
# One-time parameter preparation (padding, dtype casts, std precompute)
# ----------------------------------------------------------------------------
def prepare_params(params, *, use_bf16_inputs=True):
    """Pad hidden dim to a multiple of 128 and the action head to 128 columns,
    optionally cast matmul operands to bf16, and precompute std.  Done once per
    policy (not per forward call)."""
    H = params["w1"].shape[1]
    A = params["wm"].shape[1]
    H_pad = _round_up(H, 128)
    A_pad = _round_up(A, 128)

    # Zero padding is inert: padded hidden columns give ReLU(0)=0 and padded
    # rows/columns contribute 0 to downstream dots; padded action columns are
    # never stored.
    w1 = jnp.pad(params["w1"], ((0, 0), (0, H_pad - H)))
    b1 = jnp.pad(params["b1"].reshape(1, H), ((0, 0), (0, H_pad - H)))
    w2 = jnp.pad(params["w2"], ((0, H_pad - H), (0, H_pad - H)))
    b2 = jnp.pad(params["b2"].reshape(1, H), ((0, 0), (0, H_pad - H)))
    wm = jnp.pad(params["wm"], ((0, H_pad - H), (0, A_pad - A)))
    bm = jnp.pad(params["bm"].reshape(1, A), ((0, 0), (0, A_pad - A)))

    if use_bf16_inputs:
        # bf16 MXU operands on all generations; accumulation stays f32 in-kernel.
        w1 = w1.astype(jnp.bfloat16)
        w2 = w2.astype(jnp.bfloat16)
        wm = wm.astype(jnp.bfloat16)

    # state-independent log_std: clamp+exp computed once; broadcast is lazy/free.
    std_row = jnp.exp(
        jnp.clip(params["log_std"].reshape(1, A), LOG_STD_MIN, LOG_STD_MAX))

    return {"w1": w1, "b1": b1, "w2": w2, "b2": b2, "wm": wm, "bm": bm,
            "std_row": std_row, "num_actions": A,
            "use_bf16": bool(use_bf16_inputs)}


# ----------------------------------------------------------------------------
# Forward wrapper
# ----------------------------------------------------------------------------
def _resident_spec(shape):
    """Whole-array block, constant index_map (stays VMEM-resident), and single
    buffering (never re-fetched, so no point double-buffering it)."""
    try:
        return pl.BlockSpec(shape, lambda i: (0, 0), pipeline_mode=pl.Buffered(1))
    except TypeError:  # older JAX without pipeline_mode kwarg
        return pl.BlockSpec(shape, lambda i: (0, 0))


def gaussian_policy_forward(x, prep, *, tile_b=2048):
    """Returns (mean, std) parameterizing the DiagMultivariateNormal."""
    B, num_inputs = x.shape
    A = prep["num_actions"]
    w1, b1, w2, b2, wm, bm = (prep["w1"], prep["b1"], prep["w2"], prep["b2"],
                              prep["wm"], prep["bm"])
    H_pad = w1.shape[1]
    A_pad = wm.shape[1]

    if prep["use_bf16"]:
        x = x.astype(jnp.bfloat16)
    in_itemsize = jnp.dtype(x.dtype).itemsize

    weight_bytes = sum(int(a.size) * jnp.dtype(a.dtype).itemsize
                       for a in (w1, b1, w2, b2, wm, bm))
    if weight_bytes > (40 << 20):
        # TODO(synk): tile the hidden dimension / stream weights for very large
        # hidden_dim instead of keeping all weights VMEM-resident (v7x: 64 MiB/TC).
        raise ValueError(
            f"resident weights ({weight_bytes/2**20:.1f} MiB) exceed the VMEM "
            f"budget; use bf16 weights or a hidden-dim-tiled variant.")

    # --- batch tiling -------------------------------------------------------
    b8 = _round_up(B, 8)
    tile_b = max(8, min(tile_b, b8))
    if b8 > 8 and tile_b >= b8:
        # split so there are >=2 grid steps (megacore sharding on v7x)
        tile_b = _round_up((b8 + 1) // 2, 8)

    def _vmem_estimate(tb):
        act = tb * (2 * H_pad + A_pad) * 4                 # f32 activations
        io = 2 * tb * num_inputs * in_itemsize + 2 * tb * A * 4
        return weight_bytes + act + io

    while tile_b > 8 and _vmem_estimate(tile_b) > (48 << 20):
        tile_b = max(8, _round_up(tile_b // 2, 8))

    B_pad = _round_up(B, tile_b)
    if B_pad != B:
        x = jnp.pad(x, ((0, B_pad - B), (0, 0)))
    grid = (B_pad // tile_b,)

    vmem_limit = int(min(max(_vmem_estimate(tile_b) + (8 << 20), 32 << 20),
                         64 << 20))

    flops = 2 * B_pad * (num_inputs * H_pad + H_pad * H_pad + H_pad * A_pad)
    bytes_accessed = (B_pad * num_inputs * in_itemsize   # x stream in
                      + B_pad * A * 4                    # mean stream out (unpadded!)
                      + weight_bytes)
    cost = pl.CostEstimate(flops=flops, transcendentals=B_pad * A,
                           bytes_accessed=bytes_accessed)

    mean_pad = pl.pallas_call(
        gaussian_policy_kernel,
        out_shape=jax.ShapeDtypeStruct((B_pad, A), jnp.float32),
        grid=grid,
        in_specs=[
            pl.BlockSpec((tile_b, num_inputs), lambda i: (i, 0)),  # x: tiled batch
            _resident_spec(w1.shape), _resident_spec(b1.shape),
            _resident_spec(w2.shape), _resident_spec(b2.shape),
            _resident_spec(wm.shape), _resident_spec(bm.shape),
        ],
        out_specs=pl.BlockSpec((tile_b, A), lambda i: (i, 0)),
        compiler_params=pltpu.CompilerParams(
            dimension_semantics=("parallel",),
            vmem_limit_bytes=vmem_limit),
        cost_estimate=cost,
    )(x, w1, b1, w2, b2, wm, bm)

    mean = mean_pad[:B]
    std = jnp.broadcast_to(prep["std_row"], (B, A))
    return mean, std


# ----------------------------------------------------------------------------
# Init + reference (matches the PyTorch module's initialization)
# ----------------------------------------------------------------------------
def xavier_uniform(key, fan_in, fan_out):
    # torch.nn.init.xavier_uniform_(weight, gain=1); weights stored as [in, out]
    limit = jnp.sqrt(6.0 / (fan_in + fan_out))
    return jax.random.uniform(key, (fan_in, fan_out), jnp.float32, -limit, limit)


def init_params(key, num_inputs, num_actions, hidden_dim):
    k1, k2, k3 = jax.random.split(key, 3)
    return {
        "w1": xavier_uniform(k1, num_inputs, hidden_dim),
        "b1": jnp.zeros((1, hidden_dim), jnp.float32),       # constant_(bias, 0)
        "w2": xavier_uniform(k2, hidden_dim, hidden_dim),
        "b2": jnp.zeros((1, hidden_dim), jnp.float32),
        "wm": xavier_uniform(k3, hidden_dim, num_actions),
        "bm": jnp.zeros((1, num_actions), jnp.float32),
        "log_std": jnp.zeros((1, num_actions), jnp.float32),  # nn.Parameter(zeros(num_actions))
    }


def reference_forward(x, params):
    h = jnp.maximum(x @ params["w1"] + params["b1"], 0.0)
    h = jnp.maximum(h @ params["w2"] + params["b2"], 0.0)
    mean = jnp.tanh(h @ params["wm"] + params["bm"])
    std = jnp.broadcast_to(
        jnp.exp(jnp.clip(params["log_std"], LOG_STD_MIN, LOG_STD_MAX)), mean.shape)
    return mean, std


if __name__ == "__main__":
    key = jax.random.PRNGKey(0)
    k_param, k_x = jax.random.split(key)

    batch, num_inputs, hidden_dim, num_actions = 8, 16, 32, 8
    params = init_params(k_param, num_inputs, num_actions, hidden_dim)
    x = jax.random.normal(k_x, (batch, num_inputs), jnp.float32)

    ref_mean, ref_std = reference_forward(x, params)

    # Default path: bf16 MXU operands, f32 accumulation.
    prep = prepare_params(params, use_bf16_inputs=True)
    mean, std = gaussian_policy_forward(x, prep)
    jax.block_until_ready((mean, std))
    assert mean.shape == (batch, num_actions) and std.shape == (batch, num_actions)
    assert jnp.allclose(mean, ref_mean, atol=5e-2, rtol=5e-2)   # bf16 operand precision
    assert jnp.allclose(std, ref_std, atol=1e-6, rtol=1e-6)

    # f32 path: bit-tight numerics.
    prep_f32 = prepare_params(params, use_bf16_inputs=False)
    mean32, std32 = gaussian_policy_forward(x, prep_f32)
    jax.block_until_ready((mean32, std32))
    assert jnp.allclose(mean32, ref_mean, atol=1e-5, rtol=1e-5)
    assert jnp.allclose(std32, ref_std, atol=1e-6, rtol=1e-6)

    # TODO(synk): DiagMultivariateNormal sampling / log_prob (td.Independent(Normal))
    # is host-side glue over (mean, std) and is not part of the kernel hot path.
    print("KERNEL_OK")
</pallas_src>

<mosaic_0001>
module attributes {stable_mosaic.version = 11 : i64} {
  func.func @gaussian_policy_kernel(%arg0: i32, %arg1: memref<8x16xbf16, #tpu.memory_space<vmem>>, %arg2: memref<16x128xbf16, #tpu.memory_space<vmem>>, %arg3: memref<1x128xf32, #tpu.memory_space<vmem>>, %arg4: memref<128x128xbf16, #tpu.memory_space<vmem>>, %arg5: memref<1x128xf32, #tpu.memory_space<vmem>>, %arg6: memref<128x128xbf16, #tpu.memory_space<vmem>>, %arg7: memref<1x128xf32, #tpu.memory_space<vmem>>, %arg8: memref<8x8xf32, #tpu.memory_space<vmem>>) attributes {dimension_semantics = [#tpu.dimension_semantics<parallel>], iteration_bounds = array<i64: 1>, scalar_prefetch = 0 : i64, scratch_operands = 0 : i64, tpu.core_type = #tpu.core_type<tc>, window_params = [{transform_indices = @transform_0, window_bounds = array<i64: 8, 16>}, {pipeline_mode = #tpu.pipeline_mode<synchronous>, transform_indices = @transform_1, window_bounds = array<i64: 16, 128>}, {pipeline_mode = #tpu.pipeline_mode<synchronous>, transform_indices = @transform_2, window_bounds = array<i64: 1, 128>}, {pipeline_mode = #tpu.pipeline_mode<synchronous>, transform_indices = @transform_3, window_bounds = array<i64: 128, 128>}, {pipeline_mode = #tpu.pipeline_mode<synchronous>, transform_indices = @transform_4, window_bounds = array<i64: 1, 128>}, {pipeline_mode = #tpu.pipeline_mode<synchronous>, transform_indices = @transform_5, window_bounds = array<i64: 128, 128>}, {pipeline_mode = #tpu.pipeline_mode<synchronous>, transform_indices = @transform_6, window_bounds = array<i64: 1, 128>}, {transform_indices = @transform_7, window_bounds = array<i64: 8, 8>}]} {
    %c0 = arith.constant 0 : index
    %c0_0 = arith.constant 0 : index
    %0 = vector.load %arg1[%c0, %c0_0] : memref<8x16xbf16, #tpu.memory_space<vmem>>, vector<8x16xbf16>
    %c0_1 = arith.constant 0 : index
    %c0_2 = arith.constant 0 : index
    %1 = vector.load %arg2[%c0_1, %c0_2] : memref<16x128xbf16, #tpu.memory_space<vmem>>, vector<16x128xbf16>
    %cst = arith.constant dense<0.000000e+00> : vector<8x128xf32>
    %2 = tpu.matmul %0, %1, %cst {dimension_numbers = #tpu.dot_dimension_numbers<[1], [0], [0], [1], [0, 0, 1, 1], [], []>} : vector<8x16xbf16>, vector<16x128xbf16>, vector<8x128xf32> -> vector<8x128xf32>
    %c0_3 = arith.constant 0 : index
    %c0_4 = arith.constant 0 : index
    %3 = vector.load %arg3[%c0_3, %c0_4] : memref<1x128xf32, #tpu.memory_space<vmem>>, vector<1x128xf32>
    %4 = vector.broadcast %3 : vector<1x128xf32> to vector<8x128xf32>
    %5 = arith.addf %2, %4 : vector<8x128xf32>
    %cst_5 = arith.constant 0.000000e+00 : f32
    %6 = vector.broadcast %cst_5 : f32 to vector<8x128xf32>
    %7 = arith.maximumf %5, %6 : vector<8x128xf32>
    %8 = arith.truncf %7 : vector<8x128xf32> to vector<8x128xbf16>
    %c0_6 = arith.constant 0 : index
    %c0_7 = arith.constant 0 : index
    %9 = vector.load %arg4[%c0_6, %c0_7] : memref<128x128xbf16, #tpu.memory_space<vmem>>, vector<128x128xbf16>
    %cst_8 = arith.constant dense<0.000000e+00> : vector<8x128xf32>
    %10 = tpu.matmul %8, %9, %cst_8 {dimension_numbers = #tpu.dot_dimension_numbers<[1], [0], [0], [1], [0, 0, 1, 1], [], []>} : vector<8x128xbf16>, vector<128x128xbf16>, vector<8x128xf32> -> vector<8x128xf32>
    %c0_9 = arith.constant 0 : index
    %c0_10 = arith.constant 0 : index
    %11 = vector.load %arg5[%c0_9, %c0_10] : memref<1x128xf32, #tpu.memory_space<vmem>>, vector<1x128xf32>
    %12 = vector.broadcast %11 : vector<1x128xf32> to vector<8x128xf32>
    %13 = arith.addf %10, %12 : vector<8x128xf32>
    %cst_11 = arith.constant 0.000000e+00 : f32
    %14 = vector.broadcast %cst_11 : f32 to vector<8x128xf32>
    %15 = arith.maximumf %13, %14 : vector<8x128xf32>
    %16 = arith.truncf %15 : vector<8x128xf32> to vector<8x128xbf16>
    %c0_12 = arith.constant 0 : index
    %c0_13 = arith.constant 0 : index
    %17 = vector.load %arg6[%c0_12, %c0_13] : memref<128x128xbf16, #tpu.memory_space<vmem>>, vector<128x128xbf16>
    %cst_14 = arith.constant dense<0.000000e+00> : vector<8x128xf32>
    %18 = tpu.matmul %16, %17, %cst_14 {dimension_numbers = #tpu.dot_dimension_numbers<[1], [0], [0], [1], [0, 0, 1, 1], [], []>} : vector<8x128xbf16>, vector<128x128xbf16>, vector<8x128xf32> -> vector<8x128xf32>
    %c0_15 = arith.constant 0 : index
    %c0_16 = arith.constant 0 : index
    %19 = vector.load %arg7[%c0_15, %c0_16] : memref<1x128xf32, #tpu.memory_space<vmem>>, vector<1x128xf32>
    %20 = vector.broadcast %19 : vector<1x128xf32> to vector<8x128xf32>
    %21 = arith.addf %18, %20 : vector<8x128xf32>
    %22 = vector.extract_strided_slice %21 {offsets = [0, 0], sizes = [8, 8], strides = [1, 1]} : vector<8x128xf32> to vector<8x8xf32>
    %23 = math.tanh %22 : vector<8x8xf32>
    %c0_17 = arith.constant 0 : index
    %c0_18 = arith.constant 0 : index
    %24 = vector.load %arg8[%c0_17, %c0_18] : memref<8x8xf32, #tpu.memory_space<vmem>>, vector<8x8xf32>
    tpu.vector_store %arg8[%c0_17, %c0_18], %23 {strides = array<i32>} : memref<8x8xf32, #tpu.memory_space<vmem>>, vector<8x8xf32>,
    return
  }
  func.func @transform_0(%arg0: i32) -> (i32, i32) {
    %c0_i32 = arith.constant 0 : i32
    %c0_i32_0 = arith.constant 0 : i32
    return %arg0, %c0_i32 : i32, i32
  }
  func.func @transform_1(%arg0: i32) -> (i32, i32) {
    %c0_i32 = arith.constant 0 : i32
    %c0_i32_0 = arith.constant 0 : i32
    %c0_i32_1 = arith.constant 0 : i32
    return %c0_i32, %c0_i32_0 : i32, i32
  }
  func.func @transform_2(%arg0: i32) -> (i32, i32) {
    %c0_i32 = arith.constant 0 : i32
    %c0_i32_0 = arith.constant 0 : i32
    %c0_i32_1 = arith.constant 0 : i32
    return %c0_i32, %c0_i32_0 : i32, i32
  }
  func.func @transform_3(%arg0: i32) -> (i32, i32) {
    %c0_i32 = arith.constant 0 : i32
    %c0_i32_0 = arith.constant 0 : i32
    %c0_i32_1 = arith.constant 0 : i32
    return %c0_i32, %c0_i32_0 : i32, i32
  }
  func.func @transform_4(%arg0: i32) -> (i32, i32) {
    %c0_i32 = arith.constant 0 : i32
    %c0_i32_0 = arith.constant 0 : i32
    %c0_i32_1 = arith.constant 0 : i32
    return %c0_i32, %c0_i32_0 : i32, i32
  }
  func.func @transform_5(%arg0: i32) -> (i32, i32) {
    %c0_i32 = arith.constant 0 : i32
    %c0_i32_0 = arith.constant 0 : i32
    %c0_i32_1 = arith.constant 0 : i32
    return %c0_i32, %c0_i32_0 : i32, i32
  }
  func.func @transform_6(%arg0: i32) -> (i32, i32) {
    %c0_i32 = arith.constant 0 : i32
    %c0_i32_0 = arith.constant 0 : i32
    %c0_i32_1 = arith.constant 0 : i32
    return %c0_i32, %c0_i32_0 : i32, i32
  }
  func.func @transform_7(%arg0: i32) -> (i32, i32) {
    %c0_i32 = arith.constant 0 : i32
    %c0_i32_0 = arith.constant 0 : i32
    return %arg0, %c0_i32 : i32, i32
  }
}

</mosaic_0001>

<bundles_post_ra>
// kernel: tpu_custom_call.1
= control target key start
LH: loop header
LB: loop body
LE: loop exit
PB: predicated region body
PF: predicated region fallthrough
CT: control target
= control target key end

     0   :  { %12 = vsyncpa [#allocation3], 0  ;;  %s712_s0 = inlined_call_operand.hbm [shape: bf16[8,16], index: 0, kind: input, shape index: {}]   ;;  %s713_s1 = inlined_call_operand.hbm [shape: bf16[16,128], index: 1, kind: input, shape index: {}]   ;;  %s714_s2 = inlined_call_operand.vmem [shape: f32[1,128], index: 2, kind: input, shape index: {}]   ;;  %s715_s3 = inlined_call_operand.hbm [shape: bf16[128,128], index: 3, kind: input, shape index: {}]   ;;  %s716_s4 = inlined_call_operand.vmem [shape: f32[1,128], index: 4, kind: input, shape index: {}]   ;;  %s717_s5 = inlined_call_operand.hbm [shape: bf16[128,128], index: 5, kind: input, shape index: {}]   ;;  %s718_s6 = inlined_call_operand.vmem [shape: f32[1,128], index: 6, kind: input, shape index: {}]   ;;  %s719_s7 = inlined_call_operand.hbm [shape: f32[8,8], index: 7, kind: output, shape index: {}]  }
   0x1   :  { %13 = vsyncpa [#allocation6], 0 }
   0x2   :  { %14 = vsyncpa [#allocation9], 0 }
   0x3   :  { %15 = vsyncpa [#allocation4], 0  ;;  %s610_s24 = smov [#allocation5]  }
   0x4   :  { %s31_s25 = sshll.u32 %s610_s24, 4  ;;  %s32_s25 = int_to_ptr.vmem [resolvable:$true] %s31_s25 }
   0x5   :  { %s510_s26 = scalar_lea.vmem %s32_s25, 128  ;;  %p515_p1 = scmp.lt.s32.totalorder %s32_s25, %s32_s25 }
   0x6   :  { %p511_p0 = scmp.ne.s32.totalorder %s32_s25, %s510_s26  ;;  %p516_p2 = scmp.lt.s32.totalorder %s510_s26, %s510_s26 }
   0x8   :  { %p517_p3 = por %p516_p2, %p515_p1 }
   0xa   :  { %p518_p4 = pnand %p517_p3, %p511_p0 }
   0xc   :  { %521 = shalt.err (!%p518_p4)
}
   0xd   :  { %s611_s27 = smov 64   ;;  %s612_s28 = smov 4  }
   0xe   :  { %37 = dma.hbm_to_vmem [thread:$0]  %s713_s1, 128, %s32_s25, [#allocation6], %s611_s27, %s611_s27, %s612_s28  }
   0xf   :  { %s613_s8 = smov [#allocation2]   ;;  %s614_s10 = smov [#allocation7]  }
  0x10   :  { %s22_s9 = sshll.u32 %s613_s8, 4  ;;  %s45_s11 = sshll.u32 %s614_s10, 4  ;;  %s23_s9 = int_to_ptr.vmem [resolvable:$true] %s22_s9  ;;  %s46_s11 = int_to_ptr.vmem [resolvable:$true] %s45_s11 }
  0x11   :  { %s530_s12 = scalar_lea.vmem %s23_s9, 64  ;;  %p535_p6 = scmp.lt.s32.totalorder %s23_s9, %s23_s9 }
  0x12   :  { %p531_p5 = scmp.ne.s32.totalorder %s23_s9, %s530_s12  ;;  %p536_p7 = scmp.lt.s32.totalorder %s530_s12, %s530_s12 }
  0x14   :  { %p537_p8 = por %p536_p7, %p535_p6 }
  0x16   :  { %p538_p9 = pnand %p537_p8, %p531_p5 }
  0x18   :  { %541 = shalt.err (!%p538_p9)
}
  0x19   :  { %25 = dma.hbm_to_vmem [thread:$0]  %s712_s0, 64, %s23_s9, [#allocation3]  }
  0x1a   :  { %s550_s15 = scalar_lea.vmem %s46_s11, 1024  ;;  %p555_p11 = scmp.lt.s32.totalorder %s46_s11, %s46_s11 }
  0x1b   :  { %p551_p10 = scmp.ne.s32.totalorder %s46_s11, %s550_s15  ;;  %p556_p12 = scmp.lt.s32.totalorder %s550_s15, %s550_s15 }
  0x1d   :  { %p557_p13 = por %p556_p12, %p555_p11 }
  0x1f   :  { %p558_p0 = pnand %p557_p13, %p551_p10 }
  0x21   :  { %561 = shalt.err (!%p558_p0)
}
  0x22   :  { %51 = dma.hbm_to_vmem [thread:$0]  %s715_s3, 1024, %s46_s11, [#allocation6], %s611_s27, %s611_s27, %s612_s28  }
  0x23   :  { %s615_s17 = smov [#allocation8]  }
  0x24   :  { %s59_s18 = sshll.u32 %s615_s17, 4  ;;  %s60_s18 = int_to_ptr.vmem [resolvable:$true] %s59_s18 }
  0x25   :  { %s570_s19 = scalar_lea.vmem %s60_s18, 1024  ;;  %p575_p2 = scmp.lt.s32.totalorder %s60_s18, %s60_s18 }
  0x26   :  { %p571_p1 = scmp.ne.s32.totalorder %s60_s18, %s570_s19  ;;  %p576_p3 = scmp.lt.s32.totalorder %s570_s19, %s570_s19 }
  0x28   :  { %p577_p4 = por %p576_p3, %p575_p2 }
  0x2a   :  { %p578_p5 = pnand %p577_p4, %p571_p1 }
  0x2c   :  { %581 = shalt.err (!%p578_p5)
}
  0x2d   :  { %65 = dma.hbm_to_vmem [thread:$0]  %s717_s5, 1024, %s60_s18, [#allocation9], %s611_s27, %s611_s27, %s612_s28  }
  0x2e   :  { %602 = dma.done.wait [#allocation3], 64  }
  0x2f   :  { %603 = vsyncadd [#allocation3], 4294967232 }
  0x30   :  { %604 = dma.done.wait [#allocation6], 1152  }
  0x31   :  { %605 = vsyncadd [#allocation6], 4294966144 }
  0x32   :  { %606 = dma.done.wait [#allocation9], 1024  }
  0x33   :  { %607 = vsyncadd [#allocation9], 4294966272  ;;  %v616_v0 = vmov 0.0   ;;  %vm617_vm0 = vmmov 0   ;;  %v483_v1 = vld [vmem:[#allocation5] sm:$0xff]   ;;  %vm97_vm1 = vcmask 130048  }
  0x34   :  { %428 = vmatprep.subr.bf16.mxu0 %v616_v0  ;;  %430 = vmatprep.mubr.msk.bf16.mxu0 %vm617_vm0, %v616_v0  ;;  %v81_v2 = vld [vmem:[#allocation2] sm:$0xf]  ;;  %v484_v3 = vld [vmem:[#allocation7 + $0x38] sm:$0xff]   ;;  %v486_v5 = vld [vmem:[#allocation7 + $0x28] sm:$0xff]   ;;  %s618_s24 = smov [#allocation10]   ;;  %vm368_vm2 = vcmask 64512  }
  0x35   :  { %434 = vmatprep.subr.bf16.mxu1 %v616_v0  ;;  %450 = vmatprep.mubr.msk.bf16.mxu1 %vm617_vm0, %v616_v0  ;;  %v485_v4 = vld [vmem:[#allocation7 + $0x30] sm:$0xff]   ;;  %v487_v6 = vld [vmem:[#allocation7 + $0x20] sm:$0xff]   ;;  %v488_v7 = vld [vmem:[#allocation7 + $0x18] sm:$0xff]  }
  0x36   :  { %429 = vmatpush3.bf16.msra.mxu0 %v483_v1  ;;  %435 = vmatpush3.bf16.msra.mxu1 %v484_v3  ;;  %v489_v8 = vld [vmem:[#allocation7 + $0x10] sm:$0xff]   ;;  %v490_v9 = vld [vmem:[#allocation7 + $0x8] sm:$0xff]   ;;  %v491_v10 = vld [vmem:[#allocation7] sm:$0xff]  }
  0x37   :  { %454 = vmatprep.subr.bf16.mxu0 %v616_v0  ;;  %436 = vmatprep.subr.bf16.mxu1 %v616_v0  ;;  %v492_v11 = vld [vmem:[#allocation8 + $0x38] sm:$0xff]   ;;  %v493_v12 = vld [vmem:[#allocation8 + $0x30] sm:$0xff]   ;;  %v494_v13 = vld [vmem:[#allocation8 + $0x28] sm:$0xff]  }
  0x38   :  { %v495_v14 = vld [vmem:[#allocation8 + $0x20] sm:$0xff]   ;;  %v496_v15 = vld [vmem:[#allocation8 + $0x18] sm:$0xff]   ;;  %v497_v16 = vld [vmem:[#allocation8 + $0x10] sm:$0xff]  }
  0x39   :  { %431 = vmatmul.mubr.msk.bf16.vlgmr.msra.gmra.mxu0 %vm97_vm1, %v81_v2  ;;  %v387_v17 = vld [vmem:[%s714_s2] ss:$0 sm:$0xff]  ;;  %v498_v25 = vld [vmem:[#allocation8 + $0x8] sm:$0xff]   ;;  %v499_v26 = vld [vmem:[#allocation8] sm:$0xff]  }
  0x3a   :  { %470 = vmatprep.mubr.msk.bf16.mxu0 %vm617_vm0, %v616_v0  ;;  %437 = vmatpush3.bf16.msra.mxu1 %v485_v4  ;;  %v390_v27 = vld [vmem:[%s716_s4] ss:$0 sm:$0xff]  ;;  %s376_s4 = sshll.u32 %s618_s24, 4  ;;  %s377_s4 = int_to_ptr.vmem [resolvable:$true] %s376_s4 }
  0x3b   :  { %438 = vmatprep.subr.bf16.mxu1 %v616_v0  ;;  %455 = vmatpush3.bf16.msra.mxu0 %v492_v11  ;;  %v399_v35 = vld [vmem:[%s718_s6] ss:$0 sm:$0xff]  ;;  %s582_s25 = scalar_lea.vmem %s377_s4, 128  ;;  %p587_p7 = scmp.lt.s32.totalorder %s377_s4, %s377_s4 }
  0x3c   :  { %456 = vmatprep.subr.bf16.mxu0 %v616_v0  ;;  %p583_p6 = scmp.ne.s32.totalorder %s377_s4, %s582_s25  ;;  %p588_p8 = scmp.lt.s32.totalorder %s582_s25, %s582_s25 }
  0x3e   :  { %439 = vmatpush3.bf16.msra.mxu1 %v486_v5  ;;  %p589_p9 = por %p588_p8, %p587_p7 }
  0x3f   :  { %440 = vmatprep.subr.bf16.mxu1 %v616_v0  ;;  %457 = vmatpush3.bf16.msra.mxu0 %v493_v12 }
  0x40   :  { %458 = vmatprep.subr.bf16.mxu0 %v616_v0  ;;  %p590_p10 = pnand %p589_p9, %p583_p6 }
  0x42   :  { %441 = vmatpush3.bf16.msra.mxu1 %v487_v6 }
  0x43   :  { %442 = vmatprep.subr.bf16.mxu1 %v616_v0  ;;  %459 = vmatpush3.bf16.msra.mxu0 %v494_v13 }
  0x44   :  { %460 = vmatprep.subr.bf16.mxu0 %v616_v0 }
  0x46   :  { %443 = vmatpush3.bf16.msra.mxu1 %v488_v7 }
  0x47   :  { %444 = vmatprep.subr.bf16.mxu1 %v616_v0  ;;  %461 = vmatpush3.bf16.msra.mxu0 %v495_v14 }
  0x48   :  { %462 = vmatprep.subr.bf16.mxu0 %v616_v0 }
  0x4a   :  { %445 = vmatpush3.bf16.msra.mxu1 %v489_v8 }
  0x4b   :  { %446 = vmatprep.subr.bf16.mxu1 %v616_v0  ;;  %463 = vmatpush3.bf16.msra.mxu0 %v496_v15 }
  0x4c   :  { %464 = vmatprep.subr.bf16.mxu0 %v616_v0 }
  0x4e   :  { %447 = vmatpush3.bf16.msra.mxu1 %v490_v9 }
  0x4f   :  { %448 = vmatprep.subr.bf16.mxu1 %v616_v0  ;;  %465 = vmatpush3.bf16.msra.mxu0 %v497_v16 }
  0x50   :  { %466 = vmatprep.subr.bf16.mxu0 %v616_v0 }
  0x52   :  { %449 = vmatpush3.bf16.msra.mxu1 %v491_v10 }
  0x53   :  { %467 = vmatpush3.bf16.msra.mxu0 %v498_v25 }
  0x54   :  { %468 = vmatprep.subr.bf16.mxu0 %v616_v0 }
  0x57   :  { %469 = vmatpush3.bf16.msra.mxu0 %v499_v26 }
  0xf9   :  { %v135_v18 = vpop.f32.mrf.mxu0 }
  0xfa   :  { %v136_v19 = vadd.f32 %v387_v17, %v135_v18 }
  0xfb   :  { %v432_v20 = vpop.f32.mrf.mxu0 }
  0xfc   :  { %v141_v21 = vmax.f32 %v136_v19, 0.0 }
  0xfd   :  { %v138_v22 = vpop.f32.mrf.mxu0 }
  0xfe   :  { %v142_v23 = vpack.c.bf16 %v141_v21, %v141_v21 }
  0xff   :  { %v433_v24 = vpop.f32.mrf.mxu0 }
 0x100   :  { %451 = vmatmul.mubr.bf16.vlgmr.msra.gmra.mxu1 %v142_v23 }
 0x1c0   :  { %v248_v28 = vpop.f32.mrf.mxu1 }
 0x1c1   :  { %v249_v29 = vadd.f32 %v390_v27, %v248_v28 }
 0x1c2   :  { %v452_v30 = vpop.f32.mrf.mxu1 }
 0x1c3   :  { %v254_v31 = vmax.f32 %v249_v29, 0.0 }
 0x1c4   :  { %v251_v32 = vpop.f32.mrf.mxu1 }
 0x1c5   :  { %v255_v33 = vpack.c.bf16 %v254_v31, %v254_v31 }
 0x1c6   :  { %v453_v34 = vpop.f32.mrf.mxu1 }
 0x1c7   :  { %471 = vmatmul.mubr.bf16.vlgmr.msra.gmra.mxu0 %v255_v33 }
 0x287   :  { %v361_v36 = vpop.f32.mrf.mxu0 }
 0x288   :  { %v362_v37 = vadd.f32 %v399_v35, %v361_v36 }
 0x289   :  { %v472_v38 = vpop.f32.mrf.mxu0 }
 0x28a   :  { %500 = vtanh.f32 %v362_v37 }
 0x28b   :  { %v364_v39 = vpop.f32.mrf.mxu0 }
 0x28d   :  { %v473_v40 = vpop.f32.mrf.mxu0 }
 0x297   :  { %v501_v41 = vpop.eup %500 }
 0x298   :  { %369 = vst.msk [vmem:[#allocation10] sm:$0xff] %vm368_vm2, %v501_v41 }
 0x299   :  { %593 = shalt.err (!%p590_p10)
}
 0x29a   :  { %379 = dma.vmem_to_hbm [thread:$0]  %s377_s4, 128, %s719_s7, [#allocation4]  }
 0x29b   :  { %608 = dma.done.wait [#allocation4], 128  }
 0x29c   :  { %609 = vsyncadd [#allocation4], 4294967168 }
 0x29d   :  { %383 = vsyncpa [#allocation3], 1 }
 0x29e   :  { %384 = vsyncpa [#allocation6], 1 }
 0x29f   :  { %385 = vsyncpa [#allocation9], 1 }
 0x2a0   :  { %386 = vsyncpa [#allocation4], 1 }

</bundles_post_ra>
